<compile_context>
chip_gen: v7x
topology: tpu7x:2x2x1
jax: 0.10.0
libtpu: 0.0.40
codegen_flags: <defaults>
</compile_context>

<pallas_src>
import jax
import jax.numpy as jnp
from jax.experimental import pallas as pl
from jax.experimental.pallas import tpu as pltpu
import numpy as np


# ----------------------------- Pallas kernel --------------------------------

def bahdanau_encoder_kernel(emb_pair_ref,                  # (S*B, 2E)  rows: [x(t) | x(S-1-t)]
                            wih_ref,                       # (2E, 6H)   block-diag, gate-packed
                            whh_ref,                       # (2H, 6H)   block-diag, gate-packed
                            bgi_ref,                       # (1, 6H)    r/z: b_ih+b_hh ; n: b_ih
                            bhn_ref,                       # (1, 6H)    zeros on r/z lanes, b_hh_n on n lanes
                            wlin_ref, blin_ref,            # (2H, D), (1, D)
                            out_ref, hid_ref,              # (S, B, 2H), (B, D)
                            gi_ref, stage_ref):            # scratch (S*B, 6H), (S, B, 2H)
    S, B, twoH = out_ref.shape
    H = twoH // 2

    # ---- hoisted input projection: one big lane-dense matmul for all 6 gate blocks
    gi_ref[...] = (jnp.dot(emb_pair_ref[...], wih_ref[...],
                           preferred_element_type=jnp.float32)
                   + bgi_ref[...])

    whh = whh_ref[...]                                     # (2H, 6H)
    bhn = bhn_ref[...]                                     # (1, 6H)

    h_cat = jnp.zeros((B, twoH), jnp.float32)              # [h_fwd | h_bwd]

    # ---- fully-unrolled recurrence (S is static): fwd step i, bwd step S-1-i
    #      fused into ONE matmul per step.
    for i in range(S):
        gi = gi_ref[i * B:(i + 1) * B, :]                  # (B, 6H) static slice
        gh = jnp.dot(h_cat, whh, preferred_element_type=jnp.float32) + bhn
        rz = jax.nn.sigmoid(gi[:, :4 * H] + gh[:, :4 * H])  # r|z for both dirs: one 128-lane op
        r = rz[:, :2 * H]                                  # [r_f | r_b]
        z = rz[:, 2 * H:]                                  # [z_f | z_b]
        n = jnp.tanh(gi[:, 4 * H:] + r * gh[:, 4 * H:])    # [n_f | n_b] (b_hn already in gh)
        h_cat = n + z * (h_cat - n)
        stage_ref[i] = h_cat                               # one lane-dense (B, 2H) store

    # ---- bulk interleave into (S, B, 2H): fwd half as-is, bwd half time-reversed
    stage = stage_ref[...]
    bwd_rev = jnp.concatenate(
        [stage[S - 1 - t:S - t, :, H:] for t in range(S)], axis=0)   # (S, B, H)
    out_ref[...] = jnp.concatenate([stage[:, :, :H], bwd_rev], axis=-1)

    # ---- hidden = tanh(cat(h_f, h_b) @ Wlin + b); h_cat already is the concat
    hid_ref[...] = jnp.tanh(
        jnp.dot(h_cat, wlin_ref[...], preferred_element_type=jnp.float32)
        + blin_ref[...])


# ------------------------------- wrapper -------------------------------------

def _pack_weights(params, E, H):
    """Build block-diagonal, gate-packed matmul operands.

    Lane layout of the 6H axis: [f_r | b_r | f_z | b_z | f_n | b_n].
    (Tiny traced relayout per call; not constant-folded, but negligible.)
    """
    def split3(w):
        return w[:, :H], w[:, H:2 * H], w[:, 2 * H:]

    wf_r, wf_z, wf_n = split3(params["wih_f"])
    wb_r, wb_z, wb_n = split3(params["wih_b"])
    hf_r, hf_z, hf_n = split3(params["whh_f"])
    hb_r, hb_z, hb_n = split3(params["whh_b"])

    zE = jnp.zeros((E, H), jnp.float32)
    zH = jnp.zeros((H, H), jnp.float32)
    wih_pack = jnp.concatenate([
        jnp.concatenate([wf_r, zE, wf_z, zE, wf_n, zE], axis=1),
        jnp.concatenate([zE, wb_r, zE, wb_z, zE, wb_n], axis=1)], axis=0)   # (2E, 6H)
    whh_pack = jnp.concatenate([
        jnp.concatenate([hf_r, zH, hf_z, zH, hf_n, zH], axis=1),
        jnp.concatenate([zH, hb_r, zH, hb_z, zH, hb_n], axis=1)], axis=0)   # (2H, 6H)

    bif_r, bif_z, bif_n = split3(params["bih_f"])
    bhf_r, bhf_z, bhf_n = split3(params["bhh_f"])
    bib_r, bib_z, bib_n = split3(params["bih_b"])
    bhb_r, bhb_z, bhb_n = split3(params["bhh_b"])

    bgi_pack = jnp.concatenate(
        [bif_r + bhf_r, bib_r + bhb_r, bif_z + bhf_z, bib_z + bhb_z, bif_n, bib_n],
        axis=1)                                                             # (1, 6H)
    zb = jnp.zeros((1, H), jnp.float32)
    bhn_pack = jnp.concatenate([zb, zb, zb, zb, bhf_n, bhb_n], axis=1)      # (1, 6H)
    return wih_pack, whh_pack, bgi_pack, bhn_pack


def bahdanau_encoder(x_ids, params):
    """x_ids: (S, B) int32 token ids. Returns (outputs (S,B,2H), hidden (B,D))."""
    emb_table = params["embedding"]
    S, B = x_ids.shape
    E = emb_table.shape[1]
    H = params["whh_f"].shape[0]
    D = params["wlin"].shape[1]

    # Embedding gather (eval-mode dropout == identity).  Pair each time step with
    # its time-reversed twin along lanes so ONE block-diag matmul in the kernel
    # produces the fused fwd/bwd gate projections per step.
    embedded = emb_table[x_ids.reshape(-1)].astype(jnp.float32).reshape(S, B, E)
    emb_pair = jnp.concatenate([embedded, embedded[::-1]], axis=-1)          # (S, B, 2E)
    emb_pair = emb_pair.reshape(S * B, 2 * E)

    wih_pack, whh_pack, bgi_pack, bhn_pack = _pack_weights(params, E, H)

    vmem = pl.BlockSpec(memory_space=pltpu.MemorySpace.VMEM)

    outputs, hidden = pl.pallas_call(
        bahdanau_encoder_kernel,
        out_shape=(
            jax.ShapeDtypeStruct((S, B, 2 * H), jnp.float32),
            jax.ShapeDtypeStruct((B, D), jnp.float32),
        ),
        in_specs=[vmem] * 7,
        out_specs=(vmem, vmem),
        scratch_shapes=[
            pltpu.VMEM((S * B, 6 * H), jnp.float32),    # fused gi projection
            pltpu.VMEM((S, B, 2 * H), jnp.float32),     # per-step [h_f|h_b] staging
        ],
    )(emb_pair, wih_pack, whh_pack, bgi_pack, bhn_pack,
      params["wlin"], params["blin"])

    return outputs, hidden


# --------------------------- parameter init ----------------------------------

def init_params(key, input_dim, embedding_dim, encoder_hidden_dim, decoder_hidden_dim):
    E, H, D, V = embedding_dim, encoder_hidden_dim, decoder_hidden_dim, input_dim
    ks = jax.random.split(key, 12)
    gru_bound = 1.0 / np.sqrt(H)
    lin_bound = 1.0 / np.sqrt(2 * H)

    def u(k, shape, bound):
        return jax.random.uniform(k, shape, jnp.float32, -bound, bound)

    params = {
        # nn.Embedding default init ~ N(0, 1)
        "embedding": jax.random.normal(ks[0], (V, E), jnp.float32),
        # GRU weights stored transposed for row-major matmul: x @ W_ih^T -> (E, 3H)
        "wih_f": u(ks[1], (E, 3 * H), gru_bound),
        "whh_f": u(ks[2], (H, 3 * H), gru_bound),
        "bih_f": u(ks[3], (1, 3 * H), gru_bound),
        "bhh_f": u(ks[4], (1, 3 * H), gru_bound),
        "wih_b": u(ks[5], (E, 3 * H), gru_bound),
        "whh_b": u(ks[6], (H, 3 * H), gru_bound),
        "bih_b": u(ks[7], (1, 3 * H), gru_bound),
        "bhh_b": u(ks[8], (1, 3 * H), gru_bound),
        # Linear(2H -> D), stored as (2H, D)
        "wlin": u(ks[9], (2 * H, D), lin_bound),
        "blin": u(ks[10], (1, D), lin_bound),
    }
    return params


# ------------------------- pure-JAX reference (check) -------------------------

def reference(x_ids, params):
    emb = params["embedding"][x_ids].astype(jnp.float32)
    S, B, _E = emb.shape
    H = params["whh_f"].shape[0]

    def cell(x, h, wih, whh, bih, bhh):
        gi = x @ wih + bih
        gh = h @ whh + bhh
        r = jax.nn.sigmoid(gi[:, :H] + gh[:, :H])
        z = jax.nn.sigmoid(gi[:, H:2 * H] + gh[:, H:2 * H])
        n = jnp.tanh(gi[:, 2 * H:] + r * gh[:, 2 * H:])
        return (1.0 - z) * n + z * h

    h = jnp.zeros((B, H), jnp.float32)
    outs_f = []
    for t in range(S):
        h = cell(emb[t], h, params["wih_f"], params["whh_f"],
                 params["bih_f"], params["bhh_f"])
        outs_f.append(h)
    h_f = h

    h = jnp.zeros((B, H), jnp.float32)
    outs_b = [None] * S
    for t in range(S - 1, -1, -1):
        h = cell(emb[t], h, params["wih_b"], params["whh_b"],
                 params["bih_b"], params["bhh_b"])
        outs_b[t] = h
    h_b = h

    outputs = jnp.concatenate([jnp.stack(outs_f), jnp.stack(outs_b)], axis=-1)
    hidden = jnp.tanh(jnp.concatenate([h_f, h_b], axis=1) @ params["wlin"]
                      + params["blin"])
    return outputs, hidden


# --------------------------------- main ---------------------------------------

if __name__ == "__main__":
    input_dim = 50            # vocab size
    embedding_dim = 16
    encoder_hidden_dim = 32
    decoder_hidden_dim = 32
    dropout_p = 0.1           # unused in eval mode
    S, B = 8, 8               # seq_len, batch (B = sublane count)

    key = jax.random.PRNGKey(0)
    k_param, k_data = jax.random.split(key)
    params = init_params(k_param, input_dim, embedding_dim,
                         encoder_hidden_dim, decoder_hidden_dim)
    x_ids = jax.random.randint(k_data, (S, B), 0, input_dim, dtype=jnp.int32)

    outputs, hidden = jax.jit(bahdanau_encoder)(x_ids, params)
    outputs = jax.block_until_ready(outputs)
    hidden = jax.block_until_ready(hidden)

    ref_outputs, ref_hidden = reference(x_ids, params)

    assert outputs.shape == (S, B, 2 * encoder_hidden_dim)
    assert hidden.shape == (B, decoder_hidden_dim)
    np.testing.assert_allclose(np.asarray(outputs), np.asarray(ref_outputs),
                               rtol=1e-4, atol=1e-5)
    np.testing.assert_allclose(np.asarray(hidden), np.asarray(ref_hidden),
                               rtol=1e-4, atol=1e-5)

    print("KERNEL_OK")
</pallas_src>

<mosaic_0001>
module attributes {stable_mosaic.version = 11 : i64} {
  func.func @bahdanau_encoder_kernel(%arg0: memref<64x32xf32, #tpu.memory_space<vmem>>, %arg1: memref<32x192xf32, #tpu.memory_space<vmem>>, %arg2: memref<64x192xf32, #tpu.memory_space<vmem>>, %arg3: memref<1x192xf32, #tpu.memory_space<vmem>>, %arg4: memref<1x192xf32, #tpu.memory_space<vmem>>, %arg5: memref<64x32xf32, #tpu.memory_space<vmem>>, %arg6: memref<1x32xf32, #tpu.memory_space<vmem>>, %arg7: memref<8x8x64xf32, #tpu.memory_space<vmem>>, %arg8: memref<8x32xf32, #tpu.memory_space<vmem>>, %arg9: memref<64x192xf32, #tpu.memory_space<vmem>>, %arg10: memref<8x8x64xf32, #tpu.memory_space<vmem>>) attributes {dimension_semantics = [], scalar_prefetch = 0 : i64, scratch_operands = 2 : i64, tpu.core_type = #tpu.core_type<tc>} {
    %c0 = arith.constant 0 : index
    %c0_0 = arith.constant 0 : index
    %0 = vector.load %arg0[%c0, %c0_0] : memref<64x32xf32, #tpu.memory_space<vmem>>, vector<64x32xf32>
    %c0_1 = arith.constant 0 : index
    %c0_2 = arith.constant 0 : index
    %1 = vector.load %arg1[%c0_1, %c0_2] : memref<32x192xf32, #tpu.memory_space<vmem>>, vector<32x192xf32>
    %cst = arith.constant dense<0.000000e+00> : vector<64x192xf32>
    %2 = tpu.matmul %0, %1, %cst {dimension_numbers = #tpu.dot_dimension_numbers<[1], [0], [0], [1], [0, 0, 1, 1], [], []>} : vector<64x32xf32>, vector<32x192xf32>, vector<64x192xf32> -> vector<64x192xf32>
    %c0_3 = arith.constant 0 : index
    %c0_4 = arith.constant 0 : index
    %3 = vector.load %arg3[%c0_3, %c0_4] : memref<1x192xf32, #tpu.memory_space<vmem>>, vector<1x192xf32>
    %4 = vector.broadcast %3 : vector<1x192xf32> to vector<64x192xf32>
    %5 = arith.addf %2, %4 : vector<64x192xf32>
    %c0_5 = arith.constant 0 : index
    %c0_6 = arith.constant 0 : index
    %6 = vector.load %arg9[%c0_5, %c0_6] : memref<64x192xf32, #tpu.memory_space<vmem>>, vector<64x192xf32>
    tpu.vector_store %arg9[%c0_5, %c0_6], %5 {strides = array<i32>} : memref<64x192xf32, #tpu.memory_space<vmem>>, vector<64x192xf32>,
    %c0_7 = arith.constant 0 : index
    %c0_8 = arith.constant 0 : index
    %7 = vector.load %arg2[%c0_7, %c0_8] : memref<64x192xf32, #tpu.memory_space<vmem>>, vector<64x192xf32>
    %c0_9 = arith.constant 0 : index
    %c0_10 = arith.constant 0 : index
    %8 = vector.load %arg4[%c0_9, %c0_10] : memref<1x192xf32, #tpu.memory_space<vmem>>, vector<1x192xf32>
    %cst_11 = arith.constant 0.000000e+00 : f32
    %9 = vector.broadcast %cst_11 : f32 to vector<8x64xf32>
    %c0_12 = arith.constant 0 : index
    %c0_13 = arith.constant 0 : index
    %10 = vector.load %arg9[%c0_12, %c0_13] : memref<64x192xf32, #tpu.memory_space<vmem>>, vector<8x192xf32>
    %cst_14 = arith.constant dense<0.000000e+00> : vector<8x192xf32>
    %11 = tpu.matmul %9, %7, %cst_14 {dimension_numbers = #tpu.dot_dimension_numbers<[1], [0], [0], [1], [0, 0, 1, 1], [], []>} : vector<8x64xf32>, vector<64x192xf32>, vector<8x192xf32> -> vector<8x192xf32>
    %12 = vector.broadcast %8 : vector<1x192xf32> to vector<8x192xf32>
    %13 = arith.addf %11, %12 : vector<8x192xf32>
    %14 = vector.extract_strided_slice %10 {offsets = [0, 0], sizes = [8, 128], strides = [1, 1]} : vector<8x192xf32> to vector<8x128xf32>
    %15 = vector.extract_strided_slice %13 {offsets = [0, 0], sizes = [8, 128], strides = [1, 1]} : vector<8x192xf32> to vector<8x128xf32>
    %16 = arith.addf %14, %15 : vector<8x128xf32>
    %17 = arith.negf %16 : vector<8x128xf32>
    %18 = math.exp %17 : vector<8x128xf32>
    %cst_15 = arith.constant 1.000000e+00 : f32
    %19 = vector.broadcast %cst_15 : f32 to vector<8x128xf32>
    %20 = arith.addf %19, %18 : vector<8x128xf32>
    %21 = arith.divf %19, %20 : vector<8x128xf32>
    %22 = vector.extract_strided_slice %21 {offsets = [0, 0], sizes = [8, 64], strides = [1, 1]} : vector<8x128xf32> to vector<8x64xf32>
    %23 = vector.extract_strided_slice %21 {offsets = [0, 64], sizes = [8, 64], strides = [1, 1]} : vector<8x128xf32> to vector<8x64xf32>
    %24 = vector.extract_strided_slice %10 {offsets = [0, 128], sizes = [8, 64], strides = [1, 1]} : vector<8x192xf32> to vector<8x64xf32>
    %25 = vector.extract_strided_slice %13 {offsets = [0, 128], sizes = [8, 64], strides = [1, 1]} : vector<8x192xf32> to vector<8x64xf32>
    %26 = arith.mulf %22, %25 : vector<8x64xf32>
    %27 = arith.addf %24, %26 : vector<8x64xf32>
    %28 = math.tanh %27 : vector<8x64xf32>
    %29 = arith.subf %9, %28 : vector<8x64xf32>
    %30 = arith.mulf %23, %29 : vector<8x64xf32>
    %31 = arith.addf %28, %30 : vector<8x64xf32>
    %c0_16 = arith.constant 0 : index
    %c0_17 = arith.constant 0 : index
    %c0_18 = arith.constant 0 : index
    %32 = vector.load %arg10[%c0_16, %c0_17, %c0_18] : memref<8x8x64xf32, #tpu.memory_space<vmem>>, vector<1x8x64xf32>
    %33 = vector.shape_cast %32 : vector<1x8x64xf32> to vector<8x64xf32>
    %34 = vector.shape_cast %31 : vector<8x64xf32> to vector<1x8x64xf32>
    tpu.vector_store %arg10[%c0_16, %c0_17, %c0_18], %34 {strides = array<i32>} : memref<8x8x64xf32, #tpu.memory_space<vmem>>, vector<1x8x64xf32>,
    %c8 = arith.constant 8 : index
    %c0_19 = arith.constant 0 : index
    %35 = vector.load %arg9[%c8, %c0_19] : memref<64x192xf32, #tpu.memory_space<vmem>>, vector<8x192xf32>
    %cst_20 = arith.constant dense<0.000000e+00> : vector<8x192xf32>
    %36 = tpu.matmul %31, %7, %cst_20 {dimension_numbers = #tpu.dot_dimension_numbers<[1], [0], [0], [1], [0, 0, 1, 1], [], []>} : vector<8x64xf32>, vector<64x192xf32>, vector<8x192xf32> -> vector<8x192xf32>
    %37 = vector.broadcast %8 : vector<1x192xf32> to vector<8x192xf32>
    %38 = arith.addf %36, %37 : vector<8x192xf32>
    %39 = vector.extract_strided_slice %35 {offsets = [0, 0], sizes = [8, 128], strides = [1, 1]} : vector<8x192xf32> to vector<8x128xf32>
    %40 = vector.extract_strided_slice %38 {offsets = [0, 0], sizes = [8, 128], strides = [1, 1]} : vector<8x192xf32> to vector<8x128xf32>
    %41 = arith.addf %39, %40 : vector<8x128xf32>
    %42 = arith.negf %41 : vector<8x128xf32>
    %43 = math.exp %42 : vector<8x128xf32>
    %cst_21 = arith.constant 1.000000e+00 : f32
    %44 = vector.broadcast %cst_21 : f32 to vector<8x128xf32>
    %45 = arith.addf %44, %43 : vector<8x128xf32>
    %46 = arith.divf %44, %45 : vector<8x128xf32>
    %47 = vector.extract_strided_slice %46 {offsets = [0, 0], sizes = [8, 64], strides = [1, 1]} : vector<8x128xf32> to vector<8x64xf32>
    %48 = vector.extract_strided_slice %46 {offsets = [0, 64], sizes = [8, 64], strides = [1, 1]} : vector<8x128xf32> to vector<8x64xf32>
    %49 = vector.extract_strided_slice %35 {offsets = [0, 128], sizes = [8, 64], strides = [1, 1]} : vector<8x192xf32> to vector<8x64xf32>
    %50 = vector.extract_strided_slice %38 {offsets = [0, 128], sizes = [8, 64], strides = [1, 1]} : vector<8x192xf32> to vector<8x64xf32>
    %51 = arith.mulf %47, %50 : vector<8x64xf32>
    %52 = arith.addf %49, %51 : vector<8x64xf32>
    %53 = math.tanh %52 : vector<8x64xf32>
    %54 = arith.subf %31, %53 : vector<8x64xf32>
    %55 = arith.mulf %48, %54 : vector<8x64xf32>
    %56 = arith.addf %53, %55 : vector<8x64xf32>
    %c1 = arith.constant 1 : index
    %c0_22 = arith.constant 0 : index
    %c0_23 = arith.constant 0 : index
    %57 = vector.load %arg10[%c1, %c0_22, %c0_23] : memref<8x8x64xf32, #tpu.memory_space<vmem>>, vector<1x8x64xf32>
    %58 = vector.shape_cast %57 : vector<1x8x64xf32> to vector<8x64xf32>
    %59 = vector.shape_cast %56 : vector<8x64xf32> to vector<1x8x64xf32>
    tpu.vector_store %arg10[%c1, %c0_22, %c0_23], %59 {strides = array<i32>} : memref<8x8x64xf32, #tpu.memory_space<vmem>>, vector<1x8x64xf32>,
    %c16 = arith.constant 16 : index
    %c0_24 = arith.constant 0 : index
    %60 = vector.load %arg9[%c16, %c0_24] : memref<64x192xf32, #tpu.memory_space<vmem>>, vector<8x192xf32>
    %cst_25 = arith.constant dense<0.000000e+00> : vector<8x192xf32>
    %61 = tpu.matmul %56, %7, %cst_25 {dimension_numbers = #tpu.dot_dimension_numbers<[1], [0], [0], [1], [0, 0, 1, 1], [], []>} : vector<8x64xf32>, vector<64x192xf32>, vector<8x192xf32> -> vector<8x192xf32>
    %62 = vector.broadcast %8 : vector<1x192xf32> to vector<8x192xf32>
    %63 = arith.addf %61, %62 : vector<8x192xf32>
    %64 = vector.extract_strided_slice %60 {offsets = [0, 0], sizes = [8, 128], strides = [1, 1]} : vector<8x192xf32> to vector<8x128xf32>
    %65 = vector.extract_strided_slice %63 {offsets = [0, 0], sizes = [8, 128], strides = [1, 1]} : vector<8x192xf32> to vector<8x128xf32>
    %66 = arith.addf %64, %65 : vector<8x128xf32>
    %67 = arith.negf %66 : vector<8x128xf32>
    %68 = math.exp %67 : vector<8x128xf32>
    %cst_26 = arith.constant 1.000000e+00 : f32
    %69 = vector.broadcast %cst_26 : f32 to vector<8x128xf32>
    %70 = arith.addf %69, %68 : vector<8x128xf32>
    %71 = arith.divf %69, %70 : vector<8x128xf32>
    %72 = vector.extract_strided_slice %71 {offsets = [0, 0], sizes = [8, 64], strides = [1, 1]} : vector<8x128xf32> to vector<8x64xf32>
    %73 = vector.extract_strided_slice %71 {offsets = [0, 64], sizes = [8, 64], strides = [1, 1]} : vector<8x128xf32> to vector<8x64xf32>
    %74 = vector.extract_strided_slice %60 {offsets = [0, 128], sizes = [8, 64], strides = [1, 1]} : vector<8x192xf32> to vector<8x64xf32>
    %75 = vector.extract_strided_slice %63 {offsets = [0, 128], sizes = [8, 64], strides = [1, 1]} : vector<8x192xf32> to vector<8x64xf32>
    %76 = arith.mulf %72, %75 : vector<8x64xf32>
    %77 = arith.addf %74, %76 : vector<8x64xf32>
    %78 = math.tanh %77 : vector<8x64xf32>
    %79 = arith.subf %56, %78 : vector<8x64xf32>
    %80 = arith.mulf %73, %79 : vector<8x64xf32>
    %81 = arith.addf %78, %80 : vector<8x64xf32>
    %c2 = arith.constant 2 : index
    %c0_27 = arith.constant 0 : index
    %c0_28 = arith.constant 0 : index
    %82 = vector.load %arg10[%c2, %c0_27, %c0_28] : memref<8x8x64xf32, #tpu.memory_space<vmem>>, vector<1x8x64xf32>
    %83 = vector.shape_cast %82 : vector<1x8x64xf32> to vector<8x64xf32>
    %84 = vector.shape_cast %81 : vector<8x64xf32> to vector<1x8x64xf32>
    tpu.vector_store %arg10[%c2, %c0_27, %c0_28], %84 {strides = array<i32>} : memref<8x8x64xf32, #tpu.memory_space<vmem>>, vector<1x8x64xf32>,
    %c24 = arith.constant 24 : index
    %c0_29 = arith.constant 0 : index
    %85 = vector.load %arg9[%c24, %c0_29] : memref<64x192xf32, #tpu.memory_space<vmem>>, vector<8x192xf32>
    %cst_30 = arith.constant dense<0.000000e+00> : vector<8x192xf32>
    %86 = tpu.matmul %81, %7, %cst_30 {dimension_numbers = #tpu.dot_dimension_numbers<[1], [0], [0], [1], [0, 0, 1, 1], [], []>} : vector<8x64xf32>, vector<64x192xf32>, vector<8x192xf32> -> vector<8x192xf32>
    %87 = vector.broadcast %8 : vector<1x192xf32> to vector<8x192xf32>
    %88 = arith.addf %86, %87 : vector<8x192xf32>
    %89 = vector.extract_strided_slice %85 {offsets = [0, 0], sizes = [8, 128], strides = [1, 1]} : vector<8x192xf32> to vector<8x128xf32>
    %90 = vector.extract_strided_slice %88 {offsets = [0, 0], sizes = [8, 128], strides = [1, 1]} : vector<8x192xf32> to vector<8x128xf32>
    %91 = arith.addf %89, %90 : vector<8x128xf32>
    %92 = arith.negf %91 : vector<8x128xf32>
    %93 = math.exp %92 : vector<8x128xf32>
    %cst_31 = arith.constant 1.000000e+00 : f32
    %94 = vector.broadcast %cst_31 : f32 to vector<8x128xf32>
    %95 = arith.addf %94, %93 : vector<8x128xf32>
    %96 = arith.divf %94, %95 : vector<8x128xf32>
    %97 = vector.extract_strided_slice %96 {offsets = [0, 0], sizes = [8, 64], strides = [1, 1]} : vector<8x128xf32> to vector<8x64xf32>
    %98 = vector.extract_strided_slice %96 {offsets = [0, 64], sizes = [8, 64], strides = [1, 1]} : vector<8x128xf32> to vector<8x64xf32>
    %99 = vector.extract_strided_slice %85 {offsets = [0, 128], sizes = [8, 64], strides = [1, 1]} : vector<8x192xf32> to vector<8x64xf32>
    %100 = vector.extract_strided_slice %88 {offsets = [0, 128], sizes = [8, 64], strides = [1, 1]} : vector<8x192xf32> to vector<8x64xf32>
    %101 = arith.mulf %97, %100 : vector<8x64xf32>
    %102 = arith.addf %99, %101 : vector<8x64xf32>
    %103 = math.tanh %102 : vector<8x64xf32>
    %104 = arith.subf %81, %103 : vector<8x64xf32>
    %105 = arith.mulf %98, %104 : vector<8x64xf32>
    %106 = arith.addf %103, %105 : vector<8x64xf32>
    %c3 = arith.constant 3 : index
    %c0_32 = arith.constant 0 : index
    %c0_33 = arith.constant 0 : index
    %107 = vector.load %arg10[%c3, %c0_32, %c0_33] : memref<8x8x64xf32, #tpu.memory_space<vmem>>, vector<1x8x64xf32>
    %108 = vector.shape_cast %107 : vector<1x8x64xf32> to vector<8x64xf32>
    %109 = vector.shape_cast %106 : vector<8x64xf32> to vector<1x8x64xf32>
    tpu.vector_store %arg10[%c3, %c0_32, %c0_33], %109 {strides = array<i32>} : memref<8x8x64xf32, #tpu.memory_space<vmem>>, vector<1x8x64xf32>,
    %c32 = arith.constant 32 : index
    %c0_34 = arith.constant 0 : index
    %110 = vector.load %arg9[%c32, %c0_34] : memref<64x192xf32, #tpu.memory_space<vmem>>, vector<8x192xf32>
    %cst_35 = arith.constant dense<0.000000e+00> : vector<8x192xf32>
    %111 = tpu.matmul %106, %7, %cst_35 {dimension_numbers = #tpu.dot_dimension_numbers<[1], [0], [0], [1], [0, 0, 1, 1], [], []>} : vector<8x64xf32>, vector<64x192xf32>, vector<8x192xf32> -> vector<8x192xf32>
    %112 = vector.broadcast %8 : vector<1x192xf32> to vector<8x192xf32>
    %113 = arith.addf %111, %112 : vector<8x192xf32>
    %114 = vector.extract_strided_slice %110 {offsets = [0, 0], sizes = [8, 128], strides = [1, 1]} : vector<8x192xf32> to vector<8x128xf32>
    %115 = vector.extract_strided_slice %113 {offsets = [0, 0], sizes = [8, 128], strides = [1, 1]} : vector<8x192xf32> to vector<8x128xf32>
    %116 = arith.addf %114, %115 : vector<8x128xf32>
    %117 = arith.negf %116 : vector<8x128xf32>
    %118 = math.exp %117 : vector<8x128xf32>
    %cst_36 = arith.constant 1.000000e+00 : f32
    %119 = vector.broadcast %cst_36 : f32 to vector<8x128xf32>
    %120 = arith.addf %119, %118 : vector<8x128xf32>
    %121 = arith.divf %119, %120 : vector<8x128xf32>
    %122 = vector.extract_strided_slice %121 {offsets = [0, 0], sizes = [8, 64], strides = [1, 1]} : vector<8x128xf32> to vector<8x64xf32>
    %123 = vector.extract_strided_slice %121 {offsets = [0, 64], sizes = [8, 64], strides = [1, 1]} : vector<8x128xf32> to vector<8x64xf32>
    %124 = vector.extract_strided_slice %110 {offsets = [0, 128], sizes = [8, 64], strides = [1, 1]} : vector<8x192xf32> to vector<8x64xf32>
    %125 = vector.extract_strided_slice %113 {offsets = [0, 128], sizes = [8, 64], strides = [1, 1]} : vector<8x192xf32> to vector<8x64xf32>
    %126 = arith.mulf %122, %125 : vector<8x64xf32>
    %127 = arith.addf %124, %126 : vector<8x64xf32>
    %128 = math.tanh %127 : vector<8x64xf32>
    %129 = arith.subf %106, %128 : vector<8x64xf32>
    %130 = arith.mulf %123, %129 : vector<8x64xf32>
    %131 = arith.addf %128, %130 : vector<8x64xf32>
    %c4 = arith.constant 4 : index
    %c0_37 = arith.constant 0 : index
    %c0_38 = arith.constant 0 : index
    %132 = vector.load %arg10[%c4, %c0_37, %c0_38] : memref<8x8x64xf32, #tpu.memory_space<vmem>>, vector<1x8x64xf32>
    %133 = vector.shape_cast %132 : vector<1x8x64xf32> to vector<8x64xf32>
    %134 = vector.shape_cast %131 : vector<8x64xf32> to vector<1x8x64xf32>
    tpu.vector_store %arg10[%c4, %c0_37, %c0_38], %134 {strides = array<i32>} : memref<8x8x64xf32, #tpu.memory_space<vmem>>, vector<1x8x64xf32>,
    %c40 = arith.constant 40 : index
    %c0_39 = arith.constant 0 : index
    %135 = vector.load %arg9[%c40, %c0_39] : memref<64x192xf32, #tpu.memory_space<vmem>>, vector<8x192xf32>
    %cst_40 = arith.constant dense<0.000000e+00> : vector<8x192xf32>
    %136 = tpu.matmul %131, %7, %cst_40 {dimension_numbers = #tpu.dot_dimension_numbers<[1], [0], [0], [1], [0, 0, 1, 1], [], []>} : vector<8x64xf32>, vector<64x192xf32>, vector<8x192xf32> -> vector<8x192xf32>
    %137 = vector.broadcast %8 : vector<1x192xf32> to vector<8x192xf32>
    %138 = arith.addf %136, %137 : vector<8x192xf32>
    %139 = vector.extract_strided_slice %135 {offsets = [0, 0], sizes = [8, 128], strides = [1, 1]} : vector<8x192xf32> to vector<8x128xf32>
    %140 = vector.extract_strided_slice %138 {offsets = [0, 0], sizes = [8, 128], strides = [1, 1]} : vector<8x192xf32> to vector<8x128xf32>
    %141 = arith.addf %139, %140 : vector<8x128xf32>
    %142 = arith.negf %141 : vector<8x128xf32>
    %143 = math.exp %142 : vector<8x128xf32>
    %cst_41 = arith.constant 1.000000e+00 : f32
    %144 = vector.broadcast %cst_41 : f32 to vector<8x128xf32>
    %145 = arith.addf %144, %143 : vector<8x128xf32>
    %146 = arith.divf %144, %145 : vector<8x128xf32>
    %147 = vector.extract_strided_slice %146 {offsets = [0, 0], sizes = [8, 64], strides = [1, 1]} : vector<8x128xf32> to vector<8x64xf32>
    %148 = vector.extract_strided_slice %146 {offsets = [0, 64], sizes = [8, 64], strides = [1, 1]} : vector<8x128xf32> to vector<8x64xf32>
    %149 = vector.extract_strided_slice %135 {offsets = [0, 128], sizes = [8, 64], strides = [1, 1]} : vector<8x192xf32> to vector<8x64xf32>
    %150 = vector.extract_strided_slice %138 {offsets = [0, 128], sizes = [8, 64], strides = [1, 1]} : vector<8x192xf32> to vector<8x64xf32>
    %151 = arith.mulf %147, %150 : vector<8x64xf32>
    %152 = arith.addf %149, %151 : vector<8x64xf32>
    %153 = math.tanh %152 : vector<8x64xf32>
    %154 = arith.subf %131, %153 : vector<8x64xf32>
    %155 = arith.mulf %148, %154 : vector<8x64xf32>
    %156 = arith.addf %153, %155 : vector<8x64xf32>
    %c5 = arith.constant 5 : index
    %c0_42 = arith.constant 0 : index
    %c0_43 = arith.constant 0 : index
    %157 = vector.load %arg10[%c5, %c0_42, %c0_43] : memref<8x8x64xf32, #tpu.memory_space<vmem>>, vector<1x8x64xf32>
    %158 = vector.shape_cast %157 : vector<1x8x64xf32> to vector<8x64xf32>
    %159 = vector.shape_cast %156 : vector<8x64xf32> to vector<1x8x64xf32>
    tpu.vector_store %arg10[%c5, %c0_42, %c0_43], %159 {strides = array<i32>} : memref<8x8x64xf32, #tpu.memory_space<vmem>>, vector<1x8x64xf32>,
    %c48 = arith.constant 48 : index
    %c0_44 = arith.constant 0 : index
    %160 = vector.load %arg9[%c48, %c0_44] : memref<64x192xf32, #tpu.memory_space<vmem>>, vector<8x192xf32>
    %cst_45 = arith.constant dense<0.000000e+00> : vector<8x192xf32>
    %161 = tpu.matmul %156, %7, %cst_45 {dimension_numbers = #tpu.dot_dimension_numbers<[1], [0], [0], [1], [0, 0, 1, 1], [], []>} : vector<8x64xf32>, vector<64x192xf32>, vector<8x192xf32> -> vector<8x192xf32>
    %162 = vector.broadcast %8 : vector<1x192xf32> to vector<8x192xf32>
    %163 = arith.addf %161, %162 : vector<8x192xf32>
    %164 = vector.extract_strided_slice %160 {offsets = [0, 0], sizes = [8, 128], strides = [1, 1]} : vector<8x192xf32> to vector<8x128xf32>
    %165 = vector.extract_strided_slice %163 {offsets = [0, 0], sizes = [8, 128], strides = [1, 1]} : vector<8x192xf32> to vector<8x128xf32>
    %166 = arith.addf %164, %165 : vector<8x128xf32>
    %167 = arith.negf %166 : vector<8x128xf32>
    %168 = math.exp %167 : vector<8x128xf32>
    %cst_46 = arith.constant 1.000000e+00 : f32
    %169 = vector.broadcast %cst_46 : f32 to vector<8x128xf32>
    %170 = arith.addf %169, %168 : vector<8x128xf32>
    %171 = arith.divf %169, %170 : vector<8x128xf32>
    %172 = vector.extract_strided_slice %171 {offsets = [0, 0], sizes = [8, 64], strides = [1, 1]} : vector<8x128xf32> to vector<8x64xf32>
    %173 = vector.extract_strided_slice %171 {offsets = [0, 64], sizes = [8, 64], strides = [1, 1]} : vector<8x128xf32> to vector<8x64xf32>
    %174 = vector.extract_strided_slice %160 {offsets = [0, 128], sizes = [8, 64], strides = [1, 1]} : vector<8x192xf32> to vector<8x64xf32>
    %175 = vector.extract_strided_slice %163 {offsets = [0, 128], sizes = [8, 64], strides = [1, 1]} : vector<8x192xf32> to vector<8x64xf32>
    %176 = arith.mulf %172, %175 : vector<8x64xf32>
    %177 = arith.addf %174, %176 : vector<8x64xf32>
    %178 = math.tanh %177 : vector<8x64xf32>
    %179 = arith.subf %156, %178 : vector<8x64xf32>
    %180 = arith.mulf %173, %179 : vector<8x64xf32>
    %181 = arith.addf %178, %180 : vector<8x64xf32>
    %c6 = arith.constant 6 : index
    %c0_47 = arith.constant 0 : index
    %c0_48 = arith.constant 0 : index
    %182 = vector.load %arg10[%c6, %c0_47, %c0_48] : memref<8x8x64xf32, #tpu.memory_space<vmem>>, vector<1x8x64xf32>
    %183 = vector.shape_cast %182 : vector<1x8x64xf32> to vector<8x64xf32>
    %184 = vector.shape_cast %181 : vector<8x64xf32> to vector<1x8x64xf32>
    tpu.vector_store %arg10[%c6, %c0_47, %c0_48], %184 {strides = array<i32>} : memref<8x8x64xf32, #tpu.memory_space<vmem>>, vector<1x8x64xf32>,
    %c56 = arith.constant 56 : index
    %c0_49 = arith.constant 0 : index
    %185 = vector.load %arg9[%c56, %c0_49] : memref<64x192xf32, #tpu.memory_space<vmem>>, vector<8x192xf32>
    %cst_50 = arith.constant dense<0.000000e+00> : vector<8x192xf32>
    %186 = tpu.matmul %181, %7, %cst_50 {dimension_numbers = #tpu.dot_dimension_numbers<[1], [0], [0], [1], [0, 0, 1, 1], [], []>} : vector<8x64xf32>, vector<64x192xf32>, vector<8x192xf32> -> vector<8x192xf32>
    %187 = vector.broadcast %8 : vector<1x192xf32> to vector<8x192xf32>
    %188 = arith.addf %186, %187 : vector<8x192xf32>
    %189 = vector.extract_strided_slice %185 {offsets = [0, 0], sizes = [8, 128], strides = [1, 1]} : vector<8x192xf32> to vector<8x128xf32>
    %190 = vector.extract_strided_slice %188 {offsets = [0, 0], sizes = [8, 128], strides = [1, 1]} : vector<8x192xf32> to vector<8x128xf32>
    %191 = arith.addf %189, %190 : vector<8x128xf32>
    %192 = arith.negf %191 : vector<8x128xf32>
    %193 = math.exp %192 : vector<8x128xf32>
    %cst_51 = arith.constant 1.000000e+00 : f32
    %194 = vector.broadcast %cst_51 : f32 to vector<8x128xf32>
    %195 = arith.addf %194, %193 : vector<8x128xf32>
    %196 = arith.divf %194, %195 : vector<8x128xf32>
    %197 = vector.extract_strided_slice %196 {offsets = [0, 0], sizes = [8, 64], strides = [1, 1]} : vector<8x128xf32> to vector<8x64xf32>
    %198 = vector.extract_strided_slice %196 {offsets = [0, 64], sizes = [8, 64], strides = [1, 1]} : vector<8x128xf32> to vector<8x64xf32>
    %199 = vector.extract_strided_slice %185 {offsets = [0, 128], sizes = [8, 64], strides = [1, 1]} : vector<8x192xf32> to vector<8x64xf32>
    %200 = vector.extract_strided_slice %188 {offsets = [0, 128], sizes = [8, 64], strides = [1, 1]} : vector<8x192xf32> to vector<8x64xf32>
    %201 = arith.mulf %197, %200 : vector<8x64xf32>
    %202 = arith.addf %199, %201 : vector<8x64xf32>
    %203 = math.tanh %202 : vector<8x64xf32>
    %204 = arith.subf %181, %203 : vector<8x64xf32>
    %205 = arith.mulf %198, %204 : vector<8x64xf32>
    %206 = arith.addf %203, %205 : vector<8x64xf32>
    %c7 = arith.constant 7 : index
    %c0_52 = arith.constant 0 : index
    %c0_53 = arith.constant 0 : index
    %207 = vector.load %arg10[%c7, %c0_52, %c0_53] : memref<8x8x64xf32, #tpu.memory_space<vmem>>, vector<1x8x64xf32>
    %208 = vector.shape_cast %207 : vector<1x8x64xf32> to vector<8x64xf32>
    %209 = vector.shape_cast %206 : vector<8x64xf32> to vector<1x8x64xf32>
    tpu.vector_store %arg10[%c7, %c0_52, %c0_53], %209 {strides = array<i32>} : memref<8x8x64xf32, #tpu.memory_space<vmem>>, vector<1x8x64xf32>,
    %c0_54 = arith.constant 0 : index
    %c0_55 = arith.constant 0 : index
    %c0_56 = arith.constant 0 : index
    %210 = vector.load %arg10[%c0_54, %c0_55, %c0_56] : memref<8x8x64xf32, #tpu.memory_space<vmem>>, vector<8x8x64xf32>
    %211 = vector.extract_strided_slice %210 {offsets = [7, 0, 32], sizes = [1, 8, 32], strides = [1, 1, 1]} : vector<8x8x64xf32> to vector<1x8x32xf32>
    %212 = vector.extract_strided_slice %210 {offsets = [6, 0, 32], sizes = [1, 8, 32], strides = [1, 1, 1]} : vector<8x8x64xf32> to vector<1x8x32xf32>
    %213 = vector.extract_strided_slice %210 {offsets = [5, 0, 32], sizes = [1, 8, 32], strides = [1, 1, 1]} : vector<8x8x64xf32> to vector<1x8x32xf32>
    %214 = vector.extract_strided_slice %210 {offsets = [4, 0, 32], sizes = [1, 8, 32], strides = [1, 1, 1]} : vector<8x8x64xf32> to vector<1x8x32xf32>
    %215 = vector.extract_strided_slice %210 {offsets = [3, 0, 32], sizes = [1, 8, 32], strides = [1, 1, 1]} : vector<8x8x64xf32> to vector<1x8x32xf32>
    %216 = vector.extract_strided_slice %210 {offsets = [2, 0, 32], sizes = [1, 8, 32], strides = [1, 1, 1]} : vector<8x8x64xf32> to vector<1x8x32xf32>
    %217 = vector.extract_strided_slice %210 {offsets = [1, 0, 32], sizes = [1, 8, 32], strides = [1, 1, 1]} : vector<8x8x64xf32> to vector<1x8x32xf32>
    %218 = vector.extract_strided_slice %210 {offsets = [0, 0, 32], sizes = [1, 8, 32], strides = [1, 1, 1]} : vector<8x8x64xf32> to vector<1x8x32xf32>
    %219 = tpu.concatenate %211, %212, %213, %214, %215, %216, %217, %218 in 0 : vector<1x8x32xf32>, vector<1x8x32xf32>, vector<1x8x32xf32>, vector<1x8x32xf32>, vector<1x8x32xf32>, vector<1x8x32xf32>, vector<1x8x32xf32>, vector<1x8x32xf32> -> vector<8x8x32xf32>
    %220 = vector.extract_strided_slice %210 {offsets = [0, 0, 0], sizes = [8, 8, 32], strides = [1, 1, 1]} : vector<8x8x64xf32> to vector<8x8x32xf32>
    %221 = tpu.concatenate %220, %219 in 2 : vector<8x8x32xf32>, vector<8x8x32xf32> -> vector<8x8x64xf32>
    %c0_57 = arith.constant 0 : index
    %c0_58 = arith.constant 0 : index
    %c0_59 = arith.constant 0 : index
    %222 = vector.load %arg7[%c0_57, %c0_58, %c0_59] : memref<8x8x64xf32, #tpu.memory_space<vmem>>, vector<8x8x64xf32>
    tpu.vector_store %arg7[%c0_57, %c0_58, %c0_59], %221 {strides = array<i32>} : memref<8x8x64xf32, #tpu.memory_space<vmem>>, vector<8x8x64xf32>,
    %c0_60 = arith.constant 0 : index
    %c0_61 = arith.constant 0 : index
    %223 = vector.load %arg5[%c0_60, %c0_61] : memref<64x32xf32, #tpu.memory_space<vmem>>, vector<64x32xf32>
    %cst_62 = arith.constant dense<0.000000e+00> : vector<8x32xf32>
    %224 = tpu.matmul %206, %223, %cst_62 {dimension_numbers = #tpu.dot_dimension_numbers<[1], [0], [0], [1], [0, 0, 1, 1], [], []>} : vector<8x64xf32>, vector<64x32xf32>, vector<8x32xf32> -> vector<8x32xf32>
    %c0_63 = arith.constant 0 : index
    %c0_64 = arith.constant 0 : index
    %225 = vector.load %arg6[%c0_63, %c0_64] : memref<1x32xf32, #tpu.memory_space<vmem>>, vector<1x32xf32>
    %226 = vector.broadcast %225 : vector<1x32xf32> to vector<8x32xf32>
    %227 = arith.addf %224, %226 : vector<8x32xf32>
    %228 = math.tanh %227 : vector<8x32xf32>
    %c0_65 = arith.constant 0 : index
    %c0_66 = arith.constant 0 : index
    %229 = vector.load %arg8[%c0_65, %c0_66] : memref<8x32xf32, #tpu.memory_space<vmem>>, vector<8x32xf32>
    tpu.vector_store %arg8[%c0_65, %c0_66], %228 {strides = array<i32>} : memref<8x32xf32, #tpu.memory_space<vmem>>, vector<8x32xf32>,
    return
  }
}

</mosaic_0001>

<bundles_post_ra>
// kernel: bahdanau_encoder.1
= control target key start
LH: loop header
LB: loop body
LE: loop exit
PB: predicated region body
PF: predicated region fallthrough
CT: control target
= control target key end

     0   :  { %14 = vsyncpa [#allocation5], 0  ;;  %v1483_v7 = vmov 0.0   ;;  %vm58_vm0 = vcmask 261120   ;;  %s1907_s0 = inlined_call_operand.vmem [shape: f32[64,32], index: 0, kind: input, shape index: {}]   ;;  %s1908_s1 = inlined_call_operand.vmem [shape: f32[32,192], index: 1, kind: input, shape index: {}]   ;;  %s1909_s2 = inlined_call_operand.vmem [shape: f32[64,192], index: 2, kind: input, shape index: {}]   ;;  %s1910_s3 = inlined_call_operand.vmem [shape: f32[1,192], index: 3, kind: input, shape index: {}]   ;;  %s1911_s4 = inlined_call_operand.vmem [shape: f32[1,192], index: 4, kind: input, shape index: {}]   ;;  %s1912_s5 = inlined_call_operand.vmem [shape: f32[64,32], index: 5, kind: input, shape index: {}]   ;;  %s1913_s6 = inlined_call_operand.vmem [shape: f32[1,32], index: 6, kind: input, shape index: {}]   ;;  %s1914_s7 = inlined_call_operand.hbm [shape: f32[8,8,64], index: 7, kind: output, shape index: {0}]   ;;  %s1915_s8 = inlined_call_operand.hbm [shape: f32[8,32], index: 8, kind: output, shape index: {1}]  }
   0x1   :  { %v39_v0 = vld [vmem:[%s1908_s1 + $0x8] sm:$0xff]  ;;  %v41_v1 = vld [vmem:[%s1908_s1 + $0x18] sm:$0xff]  ;;  %v38_v5 = vld [vmem:[%s1908_s1] sm:$0xff]  ;;  %147 = vmatprep.mubr.f32.mxu0 %v1483_v7  ;;  %310 = vmatprep.mubr.f32.mxu1 %v1483_v7 }
   0x2   :  { %v214_v2 = vld [vmem:[%s1909_s2 + $0x8] sm:$0xff]  ;;  %v1229_v3 = vpack.c.bf16 %v41_v1, %v39_v0  ;;  %v216_v4 = vld [vmem:[%s1909_s2 + $0x18] sm:$0xff]  ;;  %v40_v6 = vld [vmem:[%s1908_s1 + $0x10] sm:$0xff] }
   0x3   :  { %v1556_v8 = vpack.c.bf16 %v216_v4, %v214_v2  ;;  %v1231_v9 = vpack.c.bf16 %v40_v6, %v38_v5  ;;  %v213_v10 = vld [vmem:[%s1909_s2] sm:$0xff]  ;;  %v215_v11 = vld [vmem:[%s1909_s2 + $0x10] sm:$0xff]  ;;  %v43_v12 = vld [vmem:[%s1908_s1 + $0x28] sm:$0xff] }
   0x4   :  { %1230 = vmatprep.subr.bf16.mxu0 %v1229_v3  ;;  %v1567_v13 = vpack.c.bf16 %v215_v11, %v213_v10  ;;  %v45_v14 = vld [vmem:[%s1908_s1 + $0x38] sm:$0xff]  ;;  %v218_v15 = vld [vmem:[%s1909_s2 + $0x28] sm:$0xff]  ;;  %v42_v19 = vld [vmem:[%s1908_s1 + $0x20] sm:$0xff] }
   0x5   :  { %v220_v16 = vld [vmem:[%s1909_s2 + $0x38] sm:$0xff]  ;;  %1238 = vmatprep.subr.bf16.mxu1 %v1556_v8  ;;  %1232 = vmatpush1.bf16.msra.mxu0 %v1231_v9  ;;  %v1233_v17 = vpack.c.bf16 %v45_v14, %v43_v12  ;;  %v44_v20 = vld [vmem:[%s1908_s1 + $0x30] sm:$0xff]  ;;  %v217_v21 = vld [vmem:[%s1909_s2 + $0x20] sm:$0xff] }
   0x6   :  { %v1579_v18 = vpack.c.bf16 %v220_v16, %v218_v15  ;;  %1240 = vmatpush1.bf16.msra.mxu1 %v1567_v13  ;;  %v1235_v22 = vpack.c.bf16 %v44_v20, %v42_v19  ;;  %v219_v23 = vld [vmem:[%s1909_s2 + $0x30] sm:$0xff]  ;;  %v222_v24 = vld [vmem:[%s1909_s2 + $0x48] sm:$0xff]  ;;  %v224_v26 = vld [vmem:[%s1909_s2 + $0x58] sm:$0xff] }
   0x7   :  { %1234 = vmatprep.subr.bf16.mxu0 %v1233_v17  ;;  %v1598_v25 = vpack.c.bf16 %v219_v23, %v217_v21  ;;  %v221_v27 = vld [vmem:[%s1909_s2 + $0x40] sm:$0xff]  ;;  %v223_v28 = vld [vmem:[%s1909_s2 + $0x50] sm:$0xff]  ;;  %v1609_v29 = vpack.c.bf16 %v224_v26, %v222_v24  ;;  %v226_v30 = vld [vmem:[%s1909_s2 + $0x68] sm:$0xff] }
   0x8   :  { %1242 = vmatprep.subr.bf16.mxu1 %v1579_v18  ;;  %v228_v31 = vld [vmem:[%s1909_s2 + $0x78] sm:$0xff]  ;;  %v30_v32 = vld [vmem:[%s1907_s0] sm:$0xff] }
   0x9   :  { %1236 = vmatpush1.bf16.msra.mxu0 %v1235_v22 }
   0xa   :  { %15 = vsyncpa [#allocation7], 0  ;;  %1244 = vmatpush1.bf16.msra.mxu1 %v1598_v25  ;;  %v1621_v33 = vpack.c.bf16 %v223_v28, %v221_v27  ;;  %1270 = vmatprep.subr.bf16.mxu0 %v1556_v8  ;;  %v1625_v34 = vpack.c.bf16 %v228_v31, %v226_v30  ;;  %v225_v35 = vld [vmem:[%s1909_s2 + $0x60] sm:$0xff]  ;;  %v227_v36 = vld [vmem:[%s1909_s2 + $0x70] sm:$0xff]  ;;  %v48_v38 = vlaneseq  ;;  %vm197_vm1 = vcmask 523264   ;;  %s1484_s13 = smov 64  }
   0xb   :  { %1246 = vmatprep.subr.bf16.mxu1 %v1609_v29  ;;  %v1637_v37 = vpack.c.bf16 %v227_v36, %v225_v35  ;;  %v46_v41 = vld [vmem:[%s1910_s3] sm:$0x3]  ;;  %v31_v0 = vld [vmem:[%s1907_s0 + $0x8] sm:$0xff]  ;;  %v32_v28 = vld [vmem:[%s1907_s0 + $0x10] sm:$0xff]  ;;  %vm1486_vm2 = vmmov 0  }
   0xc   :  { %1176 = vmatmul.mubr.msk.f32.vlgmr.msra.gmra.mrb[0].mxu0 %vm58_vm0, %v30_v32  ;;  %v49_v39 = vshrl.u32 %v48_v38, 7  ;;  %v229_v49 = vld [vmem:[%s1911_s4] sm:$0x3]  ;;  %v33_v30 = vld [vmem:[%s1907_s0 + $0x18] sm:$0xff]  ;;  %v35_v36 = vld [vmem:[%s1907_s0 + $0x28] sm:$0xff] }
   0xd   :  { %153 = vmatprep.mubr.f32.mxu0 %v1483_v7  ;;  %1272 = vmatpush1.bf16.msra.mxu0 %v1567_v13  ;;  %v34_v31 = vld [vmem:[%s1907_s0 + $0x20] sm:$0xff]  ;;  %v36_v38 = vld [vmem:[%s1907_s0 + $0x30] sm:$0xff] }
   0xe   :  { %1248 = vmatpush1.bf16.msra.mxu1 %v1621_v33  ;;  %1274 = vmatprep.subr.bf16.mxu0 %v1579_v18  ;;  %v50_v40 = vsub.s32 0, %v49_v39  ;;  %v54_v42 = vsub.s32 1, %v49_v39  ;;  %v37_v39 = vld [vmem:[%s1907_s0 + $0x38] sm:$0xff] }
   0xf   :  { %1250 = vmatprep.subr.bf16.mxu1 %v1625_v34 }
  0x10   :  { %v1662_v43 = vrot.slane %v46_v41, %v50_v40  ;;  %v1664_v44 = vrot.slane %v46_v41, %v54_v42  ;;  %v1672_v50 = vrot.slane %v229_v49, %v50_v40  ;;  %v1675_v58 = vrot.slane %v229_v49, %v54_v42  ;;  %1177 = vmatmul.mubr.msk.f32.gmra.mrb[2].mxu0 %vm58_vm0, %v31_v0 }
  0x11   :  { %1276 = vmatpush1.bf16.msra.mxu0 %v1598_v25  ;;  %159 = vmatprep.mubr.f32.mxu0 %v1483_v7 }
  0x12   :  { %1252 = vmatpush1.bf16.msra.mxu1 %v1637_v37  ;;  %1278 = vmatprep.subr.bf16.mxu0 %v1609_v29 }
  0x13   :  { %1254 = vmatprep.subr.bf16.mxu1 %v1556_v8 }
  0x14   :  { %1178 = vmatmul.mubr.msk.f32.gmra.mrb[4].mxu0 %vm58_vm0, %v32_v28 }
  0x15   :  { %311 = vmatmul.mubr.f32.vlgmr.msra.gmra.mrb[0].mxu1 %v1483_v7  ;;  %1280 = vmatpush1.bf16.msra.mxu0 %v1621_v33 }
  0x16   :  { %1256 = vmatpush1.bf16.msra.mxu1 %v1567_v13  ;;  %408 = vmatprep.mubr.f32.mxu1 %v1483_v7 }
  0x17   :  { %1258 = vmatprep.subr.bf16.mxu1 %v1579_v18  ;;  %1282 = vmatprep.subr.bf16.mxu0 %v1625_v34 }
  0x18   :  { %165 = vmatprep.mubr.f32.mxu0 %v1483_v7 }
  0x19   :  { %1284 = vmatpush1.bf16.msra.mxu0 %v1637_v37 }
  0x1a   :  { %1260 = vmatpush1.bf16.msra.mxu1 %v1598_v25  ;;  %1302 = vmatprep.subr.bf16.mxu0 %v1556_v8 }
  0x1b   :  { %1262 = vmatprep.subr.bf16.mxu1 %v1609_v29  ;;  %1179 = vmatmul.mubr.msk.f32.gmra.mrb[6].mxu0 %vm58_vm0, %v33_v30 }
  0x1c   :  { %171 = vmatprep.mubr.f32.mxu0 %v1483_v7 }
  0x1e   :  { %1264 = vmatpush1.bf16.msra.mxu1 %v1621_v33 }
  0x1f   :  { %1266 = vmatprep.subr.bf16.mxu1 %v1625_v34  ;;  %1180 = vmatmul.mubr.msk.f32.gmra.mrb[8].mxu0 %vm58_vm0, %v34_v31 }
  0x20   :  { %177 = vmatprep.mubr.f32.mxu0 %v1483_v7 }
  0x22   :  { %1268 = vmatpush1.bf16.msra.mxu1 %v1637_v37 }
  0x23   :  { %1286 = vmatprep.subr.bf16.mxu1 %v1556_v8  ;;  %1181 = vmatmul.mubr.msk.f32.gmra.mrb[10].mxu0 %vm58_vm0, %v35_v36 }
  0x24   :  { %183 = vmatprep.mubr.f32.mxu0 %v1483_v7 }
  0x27   :  { %1182 = vmatmul.mubr.msk.f32.gmra.mrb[12].mxu0 %vm58_vm0, %v36_v38 }
  0x28   :  { %189 = vmatprep.mubr.f32.mxu0 %v1483_v7 }
  0x2b   :  { %1183 = vmatmul.mubr.msk.f32.gmra.mrb[14].mxu0 %vm58_vm0, %v37_v39 }
  0x2c   :  { %507 = vmatprep.mubr.f32.mxu0 %v1483_v7 }
  0xdf   :  { %v149_v45 = vpop.f32.mrb[0].mxu0 }
  0xe0   :  { %v150_v46 = vadd.f32 %v149_v45, %v1662_v43  ;;  %v151_v47 = vpop.f32.mrb[1].mxu0 }
  0xe1   :  { %v152_v48 = vadd.f32 %v151_v47, %v1664_v44 }
  0xe3   :  { %198 = vst.msk [vmem:[#allocation2 + $0x8] sm:$0xff] %vm197_vm1, %v152_v48  ;;  %v155_v5 = vpop.f32.mrb[2].mxu0 }
  0xe4   :  { %v156_v6 = vadd.f32 %v155_v5, %v1662_v43  ;;  %v157_v9 = vpop.f32.mrb[3].mxu0 }
  0xe5   :  { %v158_v10 = vadd.f32 %v157_v9, %v1664_v44 }
  0xe7   :  { %200 = vst.msk [vmem:[#allocation2 + $0x18] sm:$0xff] %vm197_vm1, %v158_v10  ;;  %v161_v42 = vpop.f32.mrb[4].mxu0 }
  0xe8   :  { %v312_v51 = vpop.f32.mrb[0].mxu1  ;;  %v162_v45 = vadd.f32 %v161_v42, %v1662_v43 }
  0xe9   :  { %v313_v52 = vadd.f32 %v312_v51, %v1672_v50  ;;  %v314_v53 = vpop.f32.mrb[1].mxu1 }
  0xea   :  { %v315_v59 = vadd.f32 %v314_v53, %v1675_v58  ;;  %v231_v62 = vld [vmem:[#allocation2 + $0x8] sm:$0xff] }
  0xeb   :  { %v317_v54 = vadd.f32 %v313_v52, %v150_v46  ;;  %v163_v46 = vpop.f32.mrb[5].mxu0 }
  0xec   :  { %v164_v47 = vadd.f32 %v163_v46, %v1664_v44 }
  0xed   :  { %v1184_v55 = vmul.f32 -1.442695, %v317_v54 }
  0xee   :  { %v340_v26 = vld [vmem:[#allocation2 + $0x18] sm:$0xff]  ;;  %202 = vst.msk [vmem:[#allocation2 + $0x28] sm:$0xff] %vm197_vm1, %v164_v47  ;;  %v167_v48 = vpop.f32.mrb[6].mxu0 }
  0xef   :  { %1385 = vpow2.f32 %v1184_v55  ;;  %v1737_v49 = vadd.f32 %v167_v48, %v1662_v43  ;;  %v169_v51 = vpop.f32.mrb[7].mxu0 }
  0xf0   :  { %v170_v52 = vadd.f32 %v169_v51, %v1664_v44 }
  0xf2   :  { %204 = vst.msk [vmem:[#allocation2 + $0x38] sm:$0xff] %vm197_vm1, %v170_v52  ;;  %v173_v53 = vpop.f32.mrb[8].mxu0 }
  0xf3   :  { %v1742_v54 = vadd.f32 %v173_v53, %v1662_v43  ;;  %v175_v55 = vpop.f32.mrb[9].mxu0 }
  0xf9   :  { %v1386_v56 = vpop.eup %1385 }
  0xfa   :  { %v321_v57 = vadd.f32 1.0, %v1386_v56  ;;  %v176_v56 = vadd.f32 %v175_v55, %v1664_v44 }
  0xfc   :  { %1387 = vrcp.f32 %v321_v57  ;;  %206 = vst.msk [vmem:[#allocation2 + $0x48] sm:$0xff] %vm197_vm1, %v176_v56  ;;  %v179_v57 = vpop.f32.mrb[10].mxu0 }
 0x106   :  { %v1388_v60 = vpop.eup %1387 }
 0x107   :  { %v324_v61 = vmul.f32 %v1388_v60, %v315_v59  ;;  %v1747_v59 = vadd.f32 %v179_v57, %v1662_v43 }
 0x109   :  { %v325_v63 = vadd.f32 %v324_v61, %v231_v62 }
 0x10b   :  { %1389 = vtanh.f32 %v325_v63 }
 0x115   :  { %v1390_v1 = vpop.eup %1389 }
 0x116   :  { %v327_v2 = vsub.f32 0.0, %v1390_v1 }
 0x118   :  { %329 = vrot.lane.b32.xlu0 %v327_v2, %s1484_s13 }
 0x18a   :  { %v330_v3 = vpop.permute.xlu0 %329 }
 0x18b   :  { %v332_v4 = vmul.f32 %v1388_v60, %v330_v3  ;;  %v181_v60 = vpop.f32.mrb[11].mxu0 }
 0x18c   :  { %v182_v61 = vadd.f32 %v181_v60, %v1664_v44  ;;  %v185_v62 = vpop.f32.mrb[12].mxu0 }
 0x18d   :  { %334 = vrot.lane.b32.xlu0 %v332_v4, %s1484_s13  ;;  %v1752_v63 = vadd.f32 %v185_v62, %v1662_v43  ;;  %v187_v0 = vpop.f32.mrb[13].mxu0 }
 0x18e   :  { %208 = vst.msk [vmem:[#allocation2 + $0x58] sm:$0xff] %vm197_vm1, %v182_v61  ;;  %v191_v2 = vpop.f32.mrb[14].mxu0 }
 0x18f   :  { %v1757_v3 = vadd.f32 %v191_v2, %v1662_v43  ;;  %v193_v4 = vpop.f32.mrb[15].mxu0 }
 0x190   :  { %v194_v5 = vadd.f32 %v193_v4, %v1664_v44  ;;  %v637_v4 = vld [vmem:[#allocation2 + $0x48] sm:$0xff] }
 0x192   :  { %212 = vst.msk [vmem:[#allocation2 + $0x78] sm:$0xff] %vm197_vm1, %v194_v5 }
 0x1ff   :  { %v335_v11 = vpop.permute.xlu0 %334 }
 0x200   :  { %v337_v12 = vadd.f32 %v1390_v1, %v335_v11  ;;  %v188_v1 = vadd.f32 %v187_v0, %v1664_v44 }
 0x202   :  { %338 = vst.msk [vmem:[#allocation3] sm:$0xff] %vm197_vm1, %v337_v12  ;;  %1185 = vmatmul.mubr.msk.f32.vlgmr.msra.gmra.mrb[2].mxu1 %vm197_vm1, %v337_v12  ;;  %210 = vst.msk [vmem:[#allocation2 + $0x68] sm:$0xff] %vm197_vm1, %v188_v1 }
 0x203   :  { %1288 = vmatpush1.bf16.msra.mxu1 %v1567_v13  ;;  %606 = vmatprep.mubr.f32.mxu1 %v1483_v7 }
 0x204   :  { %1290 = vmatprep.subr.bf16.mxu1 %v1579_v18 }
 0x207   :  { %1292 = vmatpush1.bf16.msra.mxu1 %v1598_v25 }
 0x208   :  { %1294 = vmatprep.subr.bf16.mxu1 %v1609_v29 }
 0x20b   :  { %1296 = vmatpush1.bf16.msra.mxu1 %v1621_v33 }
 0x20c   :  { %1298 = vmatprep.subr.bf16.mxu1 %v1625_v34 }
 0x20f   :  { %1300 = vmatpush1.bf16.msra.mxu1 %v1637_v37 }
 0x210   :  { %1318 = vmatprep.subr.bf16.mxu1 %v1556_v8 }
 0x2d5   :  { %v410_v14 = vpop.f32.mrb[2].mxu1 }
 0x2d6   :  { %v411_v15 = vadd.f32 %v410_v14, %v1672_v50  ;;  %v412_v16 = vpop.f32.mrb[3].mxu1 }
 0x2d7   :  { %v413_v22 = vadd.f32 %v412_v16, %v1675_v58 }
 0x2d8   :  { %v415_v17 = vadd.f32 %v411_v15, %v156_v6 }
 0x2da   :  { %v1186_v19 = vmul.f32 -1.442695, %v415_v17 }
 0x2dc   :  { %1391 = vpow2.f32 %v1186_v19 }
 0x2e6   :  { %v1392_v20 = vpop.eup %1391 }
 0x2e7   :  { %v419_v21 = vadd.f32 1.0, %v1392_v20  ;;  %v439_v20 = vld [vmem:[#allocation2 + $0x28] sm:$0xff] }
 0x2e9   :  { %1393 = vrcp.f32 %v419_v21 }
 0x2f3   :  { %v1394_v23 = vpop.eup %1393 }
 0x2f4   :  { %v422_v24 = vmul.f32 %v1394_v23, %v413_v22 }
 0x2f6   :  { %v423_v27 = vadd.f32 %v422_v24, %v340_v26 }
 0x2f8   :  { %1395 = vtanh.f32 %v423_v27 }
 0x302   :  { %v1396_v32 = vpop.eup %1395 }
 0x303   :  { %v425_v35 = vsub.f32 %v337_v12, %v1396_v32 }
 0x305   :  { %427 = vrot.lane.b32.xlu1 %v425_v35, %s1484_s13 }
 0x377   :  { %v428_v40 = vpop.permute.xlu1 %427 }
 0x378   :  { %v430_v41 = vmul.f32 %v1394_v23, %v428_v40 }
 0x37a   :  { %432 = vrot.lane.b32.xlu1 %v430_v41, %s1484_s13 }
 0x3ec   :  { %v433_v6 = vpop.permute.xlu1 %432 }
 0x3ed   :  { %v435_v9 = vadd.f32 %v1396_v32, %v433_v6 }
 0x3ef   :  { %437 = vst.msk [vmem:[#allocation3 + $0x8] sm:$0xff] %vm197_vm1, %v435_v9  ;;  %1187 = vmatmul.mubr.msk.f32.vlgmr.msra.gmra.mrb[16].mxu0 %vm197_vm1, %v435_v9 }
 0x3f0   :  { %1304 = vmatpush1.bf16.msra.mxu0 %v1567_v13  ;;  %705 = vmatprep.mubr.f32.mxu0 %v1483_v7 }
 0x3f1   :  { %1306 = vmatprep.subr.bf16.mxu0 %v1579_v18 }
 0x3f4   :  { %1308 = vmatpush1.bf16.msra.mxu0 %v1598_v25 }
 0x3f5   :  { %1310 = vmatprep.subr.bf16.mxu0 %v1609_v29 }
 0x3f8   :  { %1312 = vmatpush1.bf16.msra.mxu0 %v1621_v33 }
 0x3f9   :  { %1314 = vmatprep.subr.bf16.mxu0 %v1625_v34 }
 0x3fc   :  { %1316 = vmatpush1.bf16.msra.mxu0 %v1637_v37 }
 0x3fd   :  { %1334 = vmatprep.subr.bf16.mxu0 %v1556_v8 }
 0x4c2   :  { %v509_v43 = vpop.f32.mrb[16].mxu0 }
 0x4c3   :  { %v510_v44 = vadd.f32 %v509_v43, %v1672_v50  ;;  %v511_v10 = vpop.f32.mrb[17].mxu0 }
 0x4c4   :  { %v512_v16 = vadd.f32 %v511_v10, %v1675_v58 }
 0x4c5   :  { %v514_v11 = vadd.f32 %v510_v44, %v162_v45  ;;  %v538_v45 = vld [vmem:[#allocation2 + $0x38] sm:$0xff] }
 0x4c7   :  { %v1188_v12 = vmul.f32 -1.442695, %v514_v11 }
 0x4c9   :  { %1397 = vpow2.f32 %v1188_v12 }
 0x4d3   :  { %v1398_v14 = vpop.eup %1397 }
 0x4d4   :  { %v518_v15 = vadd.f32 1.0, %v1398_v14 }
 0x4d6   :  { %1399 = vrcp.f32 %v518_v15 }
 0x4e0   :  { %v1400_v17 = vpop.eup %1399 }
 0x4e1   :  { %v521_v19 = vmul.f32 %v1400_v17, %v512_v16 }
 0x4e3   :  { %v522_v21 = vadd.f32 %v521_v19, %v439_v20 }
 0x4e5   :  { %1401 = vtanh.f32 %v522_v21 }
 0x4ef   :  { %v1402_v22 = vpop.eup %1401 }
 0x4f0   :  { %v524_v23 = vsub.f32 %v435_v9, %v1402_v22 }
 0x4f2   :  { %526 = vrot.lane.b32.xlu0 %v524_v23, %s1484_s13 }
 0x564   :  { %v527_v24 = vpop.permute.xlu0 %526 }
 0x565   :  { %v529_v26 = vmul.f32 %v1400_v17, %v527_v24 }
 0x567   :  { %531 = vrot.lane.b32.xlu1 %v529_v26, %s1484_s13 }
 0x5d9   :  { %v532_v27 = vpop.permute.xlu1 %531 }
 0x5da   :  { %v534_v28 = vadd.f32 %v1402_v22, %v532_v27  ;;  %v736_v22 = vld [vmem:[#allocation2 + $0x58] sm:$0xff] }
 0x5dc   :  { %536 = vst.msk [vmem:[#allocation3 + $0x10] sm:$0xff] %vm197_vm1, %v534_v28  ;;  %1189 = vmatmul.mubr.msk.f32.vlgmr.msra.gmra.mrb[4].mxu1 %vm197_vm1, %v534_v28 }
 0x5dd   :  { %1320 = vmatpush1.bf16.msra.mxu1 %v1567_v13  ;;  %804 = vmatprep.mubr.f32.mxu1 %v1483_v7 }
 0x5de   :  { %1322 = vmatprep.subr.bf16.mxu1 %v1579_v18 }
 0x5e1   :  { %1324 = vmatpush1.bf16.msra.mxu1 %v1598_v25 }
 0x5e2   :  { %1326 = vmatprep.subr.bf16.mxu1 %v1609_v29 }
 0x5e5   :  { %1328 = vmatpush1.bf16.msra.mxu1 %v1621_v33 }
 0x5e6   :  { %1330 = vmatprep.subr.bf16.mxu1 %v1625_v34 }
 0x5e9   :  { %1332 = vmatpush1.bf16.msra.mxu1 %v1637_v37 }
 0x5ea   :  { %1350 = vmatprep.subr.bf16.mxu1 %v1556_v8 }
 0x6af   :  { %v608_v30 = vpop.f32.mrb[4].mxu1 }
 0x6b0   :  { %v609_v31 = vadd.f32 %v608_v30, %v1672_v50  ;;  %v610_v32 = vpop.f32.mrb[5].mxu1 }
 0x6b1   :  { %v611_v40 = vadd.f32 %v610_v32, %v1675_v58 }
 0x6b2   :  { %v613_v35 = vadd.f32 %v609_v31, %v1737_v49 }
 0x6b4   :  { %v1190_v36 = vmul.f32 -1.442695, %v613_v35 }
 0x6b6   :  { %1403 = vpow2.f32 %v1190_v36 }
 0x6c0   :  { %v1404_v38 = vpop.eup %1403 }
 0x6c1   :  { %v617_v39 = vadd.f32 1.0, %v1404_v38 }
 0x6c3   :  { %1405 = vrcp.f32 %v617_v39 }
 0x6cd   :  { %v1406_v41 = vpop.eup %1405 }
 0x6ce   :  { %v620_v42 = vmul.f32 %v1406_v41, %v611_v40 }
 0x6d0   :  { %v621_v46 = vadd.f32 %v620_v42, %v538_v45 }
 0x6d2   :  { %1407 = vtanh.f32 %v621_v46 }
 0x6dc   :  { %v1408_v47 = vpop.eup %1407 }
 0x6dd   :  { %v623_v8 = vsub.f32 %v534_v28, %v1408_v47  ;;  %v1034_v28 = vld [vmem:[#allocation3 + $0x10] sm:$0xff] }
 0x6df   :  { %625 = vrot.lane.b32.xlu0 %v623_v8, %s1484_s13  ;;  %v835_v8 = vld [vmem:[#allocation2 + $0x68] sm:$0xff] }
 0x751   :  { %v626_v48 = vpop.permute.xlu0 %625 }
 0x752   :  { %v628_v51 = vmul.f32 %v1406_v41, %v626_v48 }
 0x754   :  { %630 = vrot.lane.b32.xlu1 %v628_v51, %s1484_s13 }
 0x7c6   :  { %v631_v49 = vpop.permute.xlu1 %630 }
 0x7c7   :  { %v633_v52 = vadd.f32 %v1408_v47, %v631_v49 }
 0x7c9   :  { %635 = vst.msk [vmem:[#allocation3 + $0x18] sm:$0xff] %vm197_vm1, %v633_v52  ;;  %1191 = vmatmul.mubr.msk.f32.vlgmr.msra.gmra.mrb[18].mxu0 %vm197_vm1, %v633_v52 }
 0x7ca   :  { %1336 = vmatpush1.bf16.msra.mxu0 %v1567_v13  ;;  %903 = vmatprep.mubr.f32.mxu0 %v1483_v7 }
 0x7cb   :  { %1338 = vmatprep.subr.bf16.mxu0 %v1579_v18 }
 0x7ce   :  { %1340 = vmatpush1.bf16.msra.mxu0 %v1598_v25 }
 0x7cf   :  { %1342 = vmatprep.subr.bf16.mxu0 %v1609_v29 }
 0x7d0   :  { %v1035_v11 = vld [vmem:[#allocation3 + $0x18] sm:$0xff] }
 0x7d2   :  { %1344 = vmatpush1.bf16.msra.mxu0 %v1621_v33 }
 0x7d3   :  { %1346 = vmatprep.subr.bf16.mxu0 %v1625_v34 }
 0x7d6   :  { %1348 = vmatpush1.bf16.msra.mxu0 %v1637_v37 }
 0x89c   :  { %v707_v53 = vpop.f32.mrb[18].mxu0 }
 0x89d   :  { %v708_v55 = vadd.f32 %v707_v53, %v1672_v50  ;;  %v709_v56 = vpop.f32.mrb[19].mxu0 }
 0x89e   :  { %v710_v0 = vadd.f32 %v709_v56, %v1675_v58  ;;  %v1033_v56 = vld [vmem:[#allocation3 + $0x8] sm:$0xff] }
 0x89f   :  { %v712_v57 = vadd.f32 %v708_v55, %v1742_v54 }
 0x8a1   :  { %v1192_v60 = vmul.f32 -1.442695, %v712_v57 }
 0x8a3   :  { %1409 = vpow2.f32 %v1192_v60 }
 0x8ad   :  { %v1410_v61 = vpop.eup %1409 }
 0x8ae   :  { %v716_v62 = vadd.f32 1.0, %v1410_v61 }
 0x8b0   :  { %1411 = vrcp.f32 %v716_v62 }
 0x8ba   :  { %v1412_v1 = vpop.eup %1411 }
 0x8bb   :  { %v719_v2 = vmul.f32 %v1412_v1, %v710_v0 }
 0x8bd   :  { %v720_v5 = vadd.f32 %v719_v2, %v637_v4 }
 0x8bf   :  { %1413 = vtanh.f32 %v720_v5 }
 0x8c9   :  { %v1414_v6 = vpop.eup %1413 }
 0x8ca   :  { %v722_v9 = vsub.f32 %v633_v52, %v1414_v6 }
 0x8cc   :  { %724 = vrot.lane.b32.xlu0 %v722_v9, %s1484_s13 }
 0x93e   :  { %v725_v43 = vpop.permute.xlu0 %724 }
 0x93f   :  { %v727_v44 = vmul.f32 %v1412_v1, %v725_v43 }
 0x941   :  { %729 = vrot.lane.b32.xlu1 %v727_v44, %s1484_s13 }
 0x9b3   :  { %v730_v54 = vpop.permute.xlu1 %729 }
 0x9b4   :  { %v732_v10 = vadd.f32 %v1414_v6, %v730_v54  ;;  %v934_v54 = vld [vmem:[#allocation2 + $0x78] sm:$0xff] }
 0x9b6   :  { %734 = vst.msk [vmem:[#allocation3 + $0x20] sm:$0xff] %vm197_vm1, %v732_v10  ;;  %1193 = vmatmul.mubr.msk.f32.vlgmr.msra.gmra.mrb[6].mxu1 %vm197_vm1, %v732_v10 }
 0x9b7   :  { %1352 = vmatpush1.bf16.msra.mxu1 %v1567_v13  ;;  %1002 = vmatprep.mubr.f32.mxu1 %v1483_v7 }
 0x9b8   :  { %1354 = vmatprep.subr.bf16.mxu1 %v1579_v18 }
 0x9bb   :  { %1356 = vmatpush1.bf16.msra.mxu1 %v1598_v25 }
 0x9bc   :  { %1358 = vmatprep.subr.bf16.mxu1 %v1609_v29 }
 0x9bd   :  { %v1036_v12 = vld [vmem:[#allocation3 + $0x20] sm:$0xff] }
 0x9be   :  { %v1043_v14 = vsel %vm58_vm0, %v1035_v11, %v1036_v12  ;;  %v1044_v15 = vsel %vm58_vm0, %v1036_v12, %v1035_v11  ;;  %v1056_v11 = vld [vmem:[%s1912_s5] sm:$0xff]  ;;  %v1485_v12 = vmov 0.0|0.0  }
 0x9bf   :  { %1360 = vmatpush1.bf16.msra.mxu1 %v1621_v33  ;;  %1051 = vst.msk [vmem:[#allocation4 + $0x18] sm:$0xff] %vm197_vm1, %v1043_v14  ;;  %1052 = vst.msk [vmem:[#allocation4 + $0x20] sm:$0xff] %vm197_vm1, %v1044_v15  ;;  %1365 = vmatprep.subr.bf16.mxu0 %v1485_v12  ;;  %v1059_v14 = vld [vmem:[%s1912_s5 + $0x18] sm:$0xff] }
 0x9c0   :  { %1362 = vmatprep.subr.bf16.mxu1 %v1625_v34 }
 0x9c3   :  { %1364 = vmatpush1.bf16.msra.mxu1 %v1637_v37 }
 0xa89   :  { %v806_v13 = vpop.f32.mrb[6].mxu1 }
 0xa8a   :  { %v807_v18 = vadd.f32 %v806_v13, %v1672_v50  ;;  %v808_v25 = vpop.f32.mrb[7].mxu1  ;;  %v1060_v13 = vld [vmem:[%s1912_s5 + $0x20] sm:$0xff] }
 0xa8b   :  { %v809_v33 = vadd.f32 %v808_v25, %v1675_v58 }
 0xa8c   :  { %v811_v29 = vadd.f32 %v807_v18, %v1747_v59  ;;  %v1061_v18 = vld [vmem:[%s1912_s5 + $0x28] sm:$0xff] }
 0xa8d   :  { %v1372_v25 = vpack.c.bf16 %v1061_v18, %v1060_v13 }
 0xa8e   :  { %v1194_v16 = vmul.f32 -1.442695, %v811_v29 }
 0xa90   :  { %1415 = vpow2.f32 %v1194_v16  ;;  %v1062_v16 = vld [vmem:[%s1912_s5 + $0x30] sm:$0xff] }
 0xa9a   :  { %v1416_v17 = vpop.eup %1415 }
 0xa9b   :  { %v815_v19 = vadd.f32 1.0, %v1416_v17  ;;  %v1063_v17 = vld [vmem:[%s1912_s5 + $0x38] sm:$0xff] }
 0xa9d   :  { %1417 = vrcp.f32 %v815_v19 }
 0xaa7   :  { %v1418_v20 = vpop.eup %1417 }
 0xaa8   :  { %v818_v21 = vmul.f32 %v1418_v20, %v809_v33  ;;  %v1375_v33 = vpack.c.bf16 %v1063_v17, %v1062_v16 }
 0xaaa   :  { %v819_v23 = vadd.f32 %v818_v21, %v736_v22 }
 0xaac   :  { %1419 = vtanh.f32 %v819_v23 }
 0xab6   :  { %v1420_v34 = vpop.eup %1419 }
 0xab7   :  { %v821_v37 = vsub.f32 %v732_v10, %v1420_v34 }
 0xab9   :  { %823 = vrot.lane.b32.xlu0 %v821_v37, %s1484_s13 }
 0xb2b   :  { %v824_v24 = vpop.permute.xlu0 %823 }
 0xb2c   :  { %v826_v26 = vmul.f32 %v1418_v20, %v824_v24 }
 0xb2e   :  { %828 = vrot.lane.b32.xlu1 %v826_v26, %s1484_s13 }
 0xba0   :  { %v829_v59 = vpop.permute.xlu1 %828 }
 0xba1   :  { %v831_v27 = vadd.f32 %v1420_v34, %v829_v59  ;;  %v1032_v34 = vld [vmem:[#allocation3] sm:$0xff] }
 0xba3   :  { %833 = vst.msk [vmem:[#allocation3 + $0x28] sm:$0xff] %vm197_vm1, %v831_v27  ;;  %1195 = vmatmul.mubr.msk.f32.vlgmr.msra.gmra.mrb[20].mxu0 %vm197_vm1, %v831_v27 }
 0xba4   :  { %1226 = vmatprep.mubr.msk.f32.mxu0 %vm1486_vm2, %v1483_v7 }
 0xbaa   :  { %v1037_v30 = vld [vmem:[#allocation3 + $0x28] sm:$0xff] }
 0xbab   :  { %v1042_v31 = vsel %vm58_vm0, %v1034_v28, %v1037_v30  ;;  %v1045_v32 = vsel %vm58_vm0, %v1037_v30, %v1034_v28 }
 0xbac   :  { %1050 = vst.msk [vmem:[#allocation4 + $0x10] sm:$0xff] %vm197_vm1, %v1042_v31  ;;  %1053 = vst.msk [vmem:[#allocation4 + $0x28] sm:$0xff] %vm197_vm1, %v1045_v32 }
 0xc76   :  { %v905_v35 = vpop.f32.mrb[20].mxu0 }
 0xc77   :  { %v906_v36 = vadd.f32 %v905_v35, %v1672_v50  ;;  %v907_v38 = vpop.f32.mrb[21].mxu0 }
 0xc78   :  { %v908_v45 = vadd.f32 %v907_v38, %v1675_v58 }
 0xc79   :  { %v910_v39 = vadd.f32 %v906_v36, %v1752_v63 }
 0xc7b   :  { %v1196_v40 = vmul.f32 -1.442695, %v910_v39 }
 0xc7d   :  { %1421 = vpow2.f32 %v1196_v40 }
 0xc87   :  { %v1422_v41 = vpop.eup %1421 }
 0xc88   :  { %v914_v42 = vadd.f32 1.0, %v1422_v41 }
 0xc8a   :  { %1423 = vrcp.f32 %v914_v42 }
 0xc94   :  { %v1424_v46 = vpop.eup %1423 }
 0xc95   :  { %v917_v47 = vmul.f32 %v1424_v46, %v908_v45 }
 0xc97   :  { %v918_v48 = vadd.f32 %v917_v47, %v835_v8 }
 0xc99   :  { %1425 = vtanh.f32 %v918_v48 }
 0xca3   :  { %v1426_v51 = vpop.eup %1425 }
 0xca4   :  { %v920_v49 = vsub.f32 %v831_v27, %v1426_v51 }
 0xca6   :  { %922 = vrot.lane.b32.xlu0 %v920_v49, %s1484_s13 }
 0xd18   :  { %v923_v52 = vpop.permute.xlu0 %922 }
 0xd19   :  { %v925_v53 = vmul.f32 %v1424_v46, %v923_v52 }
 0xd1b   :  { %927 = vrot.lane.b32.xlu1 %v925_v53, %s1484_s13 }
 0xd8d   :  { %v928_v63 = vpop.permute.xlu1 %927 }
 0xd8e   :  { %v930_v55 = vadd.f32 %v1426_v51, %v928_v63 }
 0xd90   :  { %932 = vst.msk [vmem:[#allocation3 + $0x30] sm:$0xff] %vm197_vm1, %v930_v55  ;;  %1197 = vmatmul.mubr.msk.f32.vlgmr.msra.gmra.mrb[8].mxu1 %vm197_vm1, %v930_v55 }
 0xd97   :  { %v1038_v57 = vld [vmem:[#allocation3 + $0x30] sm:$0xff] }
 0xd98   :  { %v1041_v60 = vsel %vm58_vm0, %v1033_v56, %v1038_v57  ;;  %v1046_v61 = vsel %vm58_vm0, %v1038_v57, %v1033_v56 }
 0xd99   :  { %1049 = vst.msk [vmem:[#allocation4 + $0x8] sm:$0xff] %vm197_vm1, %v1041_v60  ;;  %1054 = vst.msk [vmem:[#allocation4 + $0x30] sm:$0xff] %vm197_vm1, %v1046_v61 }
 0xe63   :  { %v1004_v62 = vpop.f32.mrb[8].mxu1 }
 0xe64   :  { %v1005_v0 = vadd.f32 %v1004_v62, %v1672_v50  ;;  %v1006_v1 = vpop.f32.mrb[9].mxu1  ;;  %v1057_v50 = vld [vmem:[%s1912_s5 + $0x8] sm:$0xff] }
 0xe65   :  { %v1007_v9 = vadd.f32 %v1006_v1, %v1675_v58  ;;  %v1366_v58 = vpack.c.bf16 %v1057_v50, %v1056_v11 }
 0xe66   :  { %v1009_v2 = vadd.f32 %v1005_v0, %v1757_v3  ;;  %v1058_v3 = vld [vmem:[%s1912_s5 + $0x10] sm:$0xff]  ;;  %s1487_s5 = smov [#allocation4]  }
 0xe67   :  { %1367 = vmatpush3.bf16.msra.mxu0 %v1366_v58  ;;  %v1369_v15 = vpack.c.bf16 %v1059_v14, %v1058_v3  ;;  %s1151_s16 = sshll.u32 %s1487_s5, 4  ;;  %s1152_s16 = int_to_ptr.vmem [resolvable:$true] %s1151_s16 }
 0xe68   :  { %v1198_v4 = vmul.f32 -1.442695, %v1009_v2  ;;  %1368 = vmatprep.subr.bf16.mxu0 %v1485_v12  ;;  %p1440_p1 = scmp.lt.s32.totalorder %s1152_s16, %s1152_s16 }
 0xe6a   :  { %1427 = vpow2.f32 %v1198_v4 }
 0xe6b   :  { %1370 = vmatpush3.bf16.msra.mxu0 %v1369_v15 }
 0xe6c   :  { %1371 = vmatprep.subr.bf16.mxu0 %v1485_v12 }
 0xe6f   :  { %1373 = vmatpush3.bf16.msra.mxu0 %v1372_v25 }
 0xe70   :  { %1374 = vmatprep.subr.bf16.mxu0 %v1485_v12 }
 0xe73   :  { %1376 = vmatpush3.bf16.msra.mxu0 %v1375_v33 }
 0xe74   :  { %v1428_v5 = vpop.eup %1427 }
 0xe75   :  { %v1013_v6 = vadd.f32 1.0, %v1428_v5 }
 0xe77   :  { %1429 = vrcp.f32 %v1013_v6 }
 0xe81   :  { %v1430_v43 = vpop.eup %1429 }
 0xe82   :  { %v1016_v44 = vmul.f32 %v1430_v43, %v1007_v9 }
 0xe84   :  { %v1017_v10 = vadd.f32 %v1016_v44, %v934_v54 }
 0xe86   :  { %1431 = vtanh.f32 %v1017_v10 }
 0xe90   :  { %v1432_v29 = vpop.eup %1431 }
 0xe91   :  { %v1019_v19 = vsub.f32 %v930_v55, %v1432_v29 }
 0xe93   :  { %1021 = vrot.lane.b32.xlu0 %v1019_v19, %s1484_s13 }
 0xf05   :  { %v1022_v20 = vpop.permute.xlu0 %1021 }
 0xf06   :  { %v1024_v21 = vmul.f32 %v1430_v43, %v1022_v20 }
 0xf08   :  { %1026 = vrot.lane.b32.xlu1 %v1024_v21, %s1484_s13  ;;  %s1435_s13 = scalar_lea.vmem %s1152_s16, 1024 }
 0xf09   :  { %p1436_p0 = scmp.ne.s32.totalorder %s1152_s16, %s1435_s13  ;;  %p1441_p2 = scmp.lt.s32.totalorder %s1435_s13, %s1435_s13 }
 0xf0b   :  { %p1442_p3 = por %p1441_p2, %p1440_p1 }
 0xf0d   :  { %p1443_p4 = pnand %p1442_p3, %p1436_p0 }
 0xf7a   :  { %v1027_v22 = vpop.permute.xlu1 %1026 }
 0xf7b   :  { %v1029_v23 = vadd.f32 %v1432_v29, %v1027_v22 }
 0xf7d   :  { %1031 = vst.msk [vmem:[#allocation3 + $0x38] sm:$0xff] %vm197_vm1, %v1029_v23  ;;  %1227 = vmatmul.mubr.msk.f32.vlgmr.msra.gmra.mrb[22].mxu0 %vm197_vm1, %v1029_v23 }
 0xf84   :  { %v1039_v37 = vld [vmem:[#allocation3 + $0x38] sm:$0xff] }
 0xf85   :  { %v1040_v24 = vsel %vm58_vm0, %v1032_v34, %v1039_v37  ;;  %v1047_v26 = vsel %vm58_vm0, %v1039_v37, %v1032_v34 }
 0xf86   :  { %1048 = vst.msk [vmem:[#allocation4] sm:$0xff] %vm197_vm1, %v1040_v24  ;;  %1055 = vst.msk [vmem:[#allocation4 + $0x38] sm:$0xff] %vm197_vm1, %v1047_v26 }
 0xf87   :  { %1446 = shalt.err (!%p1443_p4)
}
 0xf88   :  { %s1447_s18 = scalar_lea.hbm %s1914_s7, 1024 }
 0xf89   :  { %p1448_p5 = scmp.ne.s32.totalorder %s1914_s7, %s1447_s18  ;;  %p1451_p6 = scmp.lt.u32.totalorder %s1447_s18, %s1914_s7 }
 0xf8b   :  { %p1453_p7 = pnand %p1451_p6, %p1448_p5 }
 0xf8d   :  { %1456 = shalt.err (!%p1453_p7)
}
 0xf8e   :  { %s1488_s23 = smov 128   ;;  %s1489_s24 = smov 8   ;;  %v1199_v7 = vld [vmem:[%s1913_s6] ss:$0 sm:$0xff] }
 0xf8f   :  { %1157 = dma.vmem_to_hbm [thread:$0]  %s1152_s16, 1024, %s1914_s7, [#allocation5], %s1488_s23, %s1488_s23, %s1489_s24  }
 0xf90   :  { %s1490_s28 = smov [#allocation6]  }
 0xf91   :  { %s1164_s29 = sshll.u32 %s1490_s28, 4  ;;  %s1165_s29 = int_to_ptr.vmem [resolvable:$true] %s1164_s29 }
 0xf92   :  { %s1457_s30 = scalar_lea.vmem %s1165_s29, 128  ;;  %p1462_p9 = scmp.lt.s32.totalorder %s1165_s29, %s1165_s29 }
 0xf93   :  { %p1458_p8 = scmp.ne.s32.totalorder %s1165_s29, %s1457_s30  ;;  %p1463_p10 = scmp.lt.s32.totalorder %s1457_s30, %s1457_s30 }
 0xf95   :  { %p1464_p11 = por %p1463_p10, %p1462_p9 }
 0xf97   :  { %p1465_p12 = pnand %p1464_p11, %p1458_p8 }
0x1050   :  { %v1140_v59 = vpop.f32.mrb[22].mxu0 }
0x1051   :  { %v1141_v27 = vadd.f32 %v1199_v7, %v1140_v59  ;;  %v1228_v28 = vpop.f32.mrb[23].mxu0 }
0x1053   :  { %1433 = vtanh.f32 %v1141_v27 }
0x105d   :  { %v1434_v30 = vpop.eup %1433 }
0x105e   :  { %1145 = vst.msk [vmem:[#allocation6] sm:$0xff] %vm58_vm0, %v1434_v30 }
0x105f   :  { %1468 = shalt.err (!%p1465_p12)
}
0x1060   :  { %s1469_s6 = scalar_lea.hbm %s1915_s8, 128 }
0x1061   :  { %p1470_p13 = scmp.ne.s32.totalorder %s1915_s8, %s1469_s6  ;;  %p1473_p0 = scmp.lt.u32.totalorder %s1469_s6, %s1915_s8 }
0x1063   :  { %p1475_p1 = pnand %p1473_p0, %p1470_p13 }
0x1065   :  { %1478 = shalt.err (!%p1475_p1)
}
0x1066   :  { %1167 = dma.vmem_to_hbm [thread:$0]  %s1165_s29, 128, %s1915_s8, [#allocation7]  }
0x1067   :  { %1479 = dma.done.wait [#allocation5], 1024  }
0x1068   :  { %1480 = vsyncadd [#allocation5], 4294966272 }
0x1069   :  { %1481 = dma.done.wait [#allocation7], 128  }
0x106a   :  { %1482 = vsyncadd [#allocation7], 4294967168 }
0x106b   :  { %1174 = vsyncpa [#allocation5], 1 }
0x106c   :  { %1175 = vsyncpa [#allocation7], 1 }

</bundles_post_ra>
